<compile_context>
chip_gen: v7x
topology: tpu7x:2x2x1
jax: 0.10.0
libtpu: 0.0.40
codegen_flags: <defaults>
</compile_context>

<pallas_src>
import functools

import jax
import jax.numpy as jnp
import numpy as np
from jax.experimental import pallas as pl

_LANES = 128  # lane width of the packed input/output slabs


# ----------------------------- in-kernel helpers ----------------------------- #

def _gumbel_softmax_rows(logits, eps, inv_tau, num_cls):
    """Relaxed categorical sample + one-hot(argmax) over the leading class axis.

    `logits`/`eps` are (num_cls, W).  The class reduction is a num_cls-way
    unrolled running-max / add / compare-select (pure VPU ops, no XLU cross-lane
    reduce).  Returns two lists of (1, W) rows: continuous softmax rows and
    one-hot(argmax) rows.  First-max tie-breaking matches torch.argmax.
    """
    gumbel = -jnp.log(-jnp.log(eps))
    x = (logits + gumbel) * inv_tau                       # (num_cls, W)
    rows = [x[i:i + 1, :] for i in range(num_cls)]

    m = rows[0]
    idx = jnp.zeros_like(m)
    for i in range(1, num_cls):
        gt = rows[i] > m
        idx = jnp.where(gt, jnp.full_like(idx, float(i)), idx)
        m = jnp.where(gt, rows[i], m)

    exps = [jnp.exp(r - m) for r in rows]
    s = exps[0]
    for i in range(1, num_cls):
        s = s + exps[i]
    inv_s = 1.0 / s                                       # one exact reciprocal / column

    cont = [e * inv_s for e in exps]
    disc = [(idx == float(i)).astype(jnp.float32) for i in range(num_cls)]
    return cont, disc


def _graph_sampler_kernel(p_ref, eps_ref, out_ref, *, inv_tau, k, l):
    """Fused sampler.  p_ref/eps_ref: (k+l+1, 128); out_ref: (2*(k+l+1), 128).

    Input rows :  [0,k) xi^T | [k,k+l) eta^T | k+l omega
    Output rows:  [0,k) X_cont | [k,2k) X_disc | [2k,2k+l) E_cont |
                  [2k+l,2k+2l) E_disc | 2k+2l A_cont | 2k+2l+1 A_disc
    """
    p = p_ref[...]
    eps = eps_ref[...]

    xi,    eps_x = p[0:k, :],             eps[0:k, :]
    eta,   eps_e = p[k:k + l, :],         eps[k:k + l, :]
    omega, eps_a = p[k + l:k + l + 1, :], eps[k + l:k + l + 1, :]

    x_cont, x_disc = _gumbel_softmax_rows(xi, eps_x, inv_tau, k)
    e_cont, e_disc = _gumbel_softmax_rows(eta, eps_e, inv_tau, l)

    # binary Concrete relaxation for edge weights
    logistic = jnp.log(eps_a) - jnp.log(1.0 - eps_a)      # logit(eps)
    z = (omega + logistic) * inv_tau
    a_cont = 1.0 / (1.0 + jnp.exp(-z))                    # sigmoid
    a_disc = (a_cont > 0.5).astype(jnp.float32)

    # single lane-dense unmasked store of the whole packed result slab
    out_ref[...] = jnp.concatenate(
        x_cont + x_disc + e_cont + e_disc + [a_cont, a_disc], axis=0)


# ------------------------------- pallas_call -------------------------------- #

def _fused_sample(p_slab, eps_slab, *, tau, k, l, rows_out):
    kern = functools.partial(_graph_sampler_kernel,
                             inv_tau=1.0 / float(tau), k=k, l=l)
    # Gridless call: whole arrays are the blocks (VMEM-resident), no grid-step
    # or double-buffer machinery for this one-shot elementwise kernel.
    return pl.pallas_call(
        kern,
        out_shape=jax.ShapeDtypeStruct((rows_out, p_slab.shape[1]), jnp.float32),
    )(p_slab, eps_slab)


def _pad_lanes(x, width):
    return jnp.pad(x, ((0, 0), (0, width - x.shape[1])))


def _forward_impl(xi, omega, eta, key, labels_table, *, tau):
    """Single-dispatch forward: pack params -> fused kernel -> free slices."""
    n, k = xi.shape
    m, l = eta.shape
    rows_in = k + l + 1
    rows_out = 2 * (k + l + 1)

    k_noise, k_y = jax.random.split(key)

    # pack parameters into one lane-dense (rows_in, 128) slab (long axis last)
    p_slab = jnp.concatenate([
        _pad_lanes(xi.T.astype(jnp.float32), _LANES),              # (k, n) -> (k, 128)
        _pad_lanes(eta.T.astype(jnp.float32), _LANES),             # (l, m) -> (l, 128)
        _pad_lanes(omega.astype(jnp.float32)[None, :], _LANES),    # (1, m) -> (1, 128)
    ], axis=0)

    # one uniform draw covers all three noise tensors (open interval for logs)
    eps_slab = jax.random.uniform(k_noise, (rows_in, _LANES), jnp.float32,
                                  minval=1e-6, maxval=1.0 - 1e-6)

    out = _fused_sample(p_slab, eps_slab, tau=tau, k=k, l=l, rows_out=rows_out)

    # free static slices of the packed output slab
    r = 0
    x_cont = out[r:r + k, :n].T; r += k                   # (n, k)
    x_disc = out[r:r + k, :n].T; r += k
    e_cont_h = out[r:r + l, :m].T; r += l                  # (m, l)
    e_disc_h = out[r:r + l, :m].T; r += l
    a_cont_h = out[r, :m]; r += 1                          # (m,)
    a_disc_h = out[r, :m]

    # the 2x duplication the consumer expects, done once in the wrapper
    a_cont = jnp.concatenate([a_cont_h, a_cont_h], axis=0)          # (2m,)
    a_disc = jnp.concatenate([a_disc_h, a_disc_h], axis=0)
    e_cont = jnp.concatenate([e_cont_h, e_cont_h], axis=0)          # (2m, l)
    e_disc = jnp.concatenate([e_disc_h, e_disc_h], axis=0)

    labels = jax.random.choice(k_y, labels_table, shape=(n,))
    return x_cont, x_disc, a_cont, a_disc, e_cont, e_disc, labels


# ------------------------------ module wrapper ------------------------------ #

class GraphSamplerPallas:
    """JAX/Pallas re-implementation of GraphSampler.forward (learn_node_feat and
    learn_edge_feat both True, candidate edges = complete graph)."""

    def __init__(self, dataset="dblp", max_nodes=8, num_node_cls=4,
                 num_edge_cls=3, temperature=1.0, seed=0):
        self.dataset = dataset
        self.n = max_nodes
        self.k = num_node_cls
        self.l = num_edge_cls
        self.tau = float(temperature)

        # candidate edges: complete graph, i < j
        self.edges = [(i, j) for i in range(self.n) for j in range(self.n) if i < j]
        self.m = len(self.edges)
        # TODO(synk): lane packing assumes n, m <= 128; tile m along lanes when scaling.
        assert self.n <= _LANES and self.m <= _LANES

        fwd = np.asarray(self.edges, dtype=np.int32)
        self.edge_index = jnp.asarray(
            np.concatenate([fwd, fwd[:, ::-1]], axis=0).T)          # (2, 2m)

        # deterministic parameter init, mirroring GraphSampler.init(G=None)
        key = jax.random.PRNGKey(seed)
        k1, k2, k3 = jax.random.split(key, 3)
        theta = jax.random.uniform(k1, (self.m,), minval=1e-4, maxval=1.0 - 1e-4)
        self.omega = jnp.log(theta) - jnp.log1p(-theta)              # logit(theta)
        p = jax.random.dirichlet(k2, jnp.ones(self.k), (self.n,))
        self.xi = jnp.log(p)                                         # (n, k)
        q = jax.random.dirichlet(k3, jnp.ones(self.l), (self.m,))
        self.eta = jnp.log(q)                                        # (m, l)

        self._labels_table = jnp.asarray(self._unique_labels(), dtype=jnp.int32)
        self._forward_jit = jax.jit(functools.partial(_forward_impl, tau=self.tau))

    def _unique_labels(self):
        if self.dataset in ["dblp", "pubmed"]:
            return [0, 1, 2, 3, -1]
        if self.dataset in ["imdb"]:
            return [0, 1, 2, -1]
        if self.dataset in ["BA_shapes"]:
            return [0, 1, 2, 3]
        if self.dataset in ["TreeCycle", "TreeGrids", "mutag"]:
            return [0, 1]
        return [0, 1, 2]

    def forward(self, key, mode="both"):
        (X_cont, X_disc, A_cont, A_disc,
         E_cont, E_disc, labels) = self._forward_jit(
            self.xi, self.omega, self.eta, key, self._labels_table)

        # TODO(synk): pyg.data.Batch / networkx packaging has no Pallas
        # equivalent; return plain dicts of the same tensors instead.
        cont = {"x": X_cont, "edge_index": self.edge_index,
                "edge_weight": A_cont, "edge_attr": E_cont, "y": labels}
        disc = {"x": X_disc, "edge_index": self.edge_index,
                "edge_weight": A_disc, "edge_attr": E_disc, "y": labels}
        if mode == "continuous":
            return cont
        if mode == "discrete":
            return disc
        return cont, disc


# ----------------------------------- main ----------------------------------- #

if __name__ == "__main__":
    sampler = GraphSamplerPallas(dataset="dblp", max_nodes=8, num_node_cls=4,
                                 num_edge_cls=3, temperature=1.0, seed=0)
    cont, disc = sampler.forward(jax.random.PRNGKey(0), mode="both")
    jax.block_until_ready(cont)
    jax.block_until_ready(disc)

    n, k, m, l = sampler.n, sampler.k, sampler.m, sampler.l
    assert cont["x"].shape == (n, k)
    assert cont["edge_weight"].shape == (2 * m,)
    assert cont["edge_attr"].shape == (2 * m, l)
    assert disc["x"].shape == (n, k)
    assert cont["edge_index"].shape == (2, 2 * m)
    assert cont["y"].shape == (n,)

    x_cont = np.asarray(cont["x"])
    e_cont = np.asarray(cont["edge_attr"])
    a_cont = np.asarray(cont["edge_weight"])
    x_disc = np.asarray(disc["x"])
    e_disc = np.asarray(disc["edge_attr"])
    a_disc = np.asarray(disc["edge_weight"])
    labels = np.asarray(cont["y"])

    # continuous softmaxes sum to 1; edge weights in (0,1); duplicated halves match
    assert np.allclose(x_cont.sum(-1), 1.0, atol=1e-5)
    assert np.allclose(e_cont.sum(-1), 1.0, atol=1e-5)
    assert np.all((a_cont > 0.0) & (a_cont < 1.0))
    assert np.allclose(a_cont[:m], a_cont[m:])
    assert np.allclose(e_cont[:m], e_cont[m:])
    # discrete outputs are one-hot / {0,1} and consistent with the relaxed samples
    assert np.allclose(x_disc.sum(-1), 1.0, atol=1e-6)
    assert np.allclose(e_disc.sum(-1), 1.0, atol=1e-6)
    assert set(np.unique(x_disc)).issubset({0.0, 1.0})
    assert set(np.unique(e_disc)).issubset({0.0, 1.0})
    assert set(np.unique(a_disc)).issubset({0.0, 1.0})
    assert np.array_equal(x_disc.argmax(-1), x_cont.argmax(-1))
    assert np.array_equal(e_disc.argmax(-1), e_cont.argmax(-1))
    assert np.array_equal(a_disc, (a_cont > 0.5).astype(np.float32))
    assert set(labels.tolist()).issubset({0, 1, 2, 3, -1})

    print("KERNEL_OK")
</pallas_src>

<mosaic_0001>
module attributes {stable_mosaic.version = 11 : i64} {
  func.func @_graph_sampler_kernel(%arg0: memref<8x128xf32, #tpu.memory_space<vmem>>, %arg1: memref<8x128xf32, #tpu.memory_space<vmem>>, %arg2: memref<16x128xf32, #tpu.memory_space<vmem>>) attributes {dimension_semantics = [], scalar_prefetch = 0 : i64, scratch_operands = 0 : i64, tpu.core_type = #tpu.core_type<tc>} {
    %c0 = arith.constant 0 : index
    %c0_0 = arith.constant 0 : index
    %0 = vector.load %arg0[%c0, %c0_0] : memref<8x128xf32, #tpu.memory_space<vmem>>, vector<8x128xf32>
    %c0_1 = arith.constant 0 : index
    %c0_2 = arith.constant 0 : index
    %1 = vector.load %arg1[%c0_1, %c0_2] : memref<8x128xf32, #tpu.memory_space<vmem>>, vector<8x128xf32>
    %2 = vector.extract_strided_slice %0 {offsets = [0, 0], sizes = [4, 128], strides = [1, 1]} : vector<8x128xf32> to vector<4x128xf32>
    %3 = vector.extract_strided_slice %1 {offsets = [0, 0], sizes = [4, 128], strides = [1, 1]} : vector<8x128xf32> to vector<4x128xf32>
    %4 = vector.extract_strided_slice %0 {offsets = [4, 0], sizes = [3, 128], strides = [1, 1]} : vector<8x128xf32> to vector<3x128xf32>
    %5 = vector.extract_strided_slice %1 {offsets = [4, 0], sizes = [3, 128], strides = [1, 1]} : vector<8x128xf32> to vector<3x128xf32>
    %6 = vector.extract_strided_slice %0 {offsets = [7, 0], sizes = [1, 128], strides = [1, 1]} : vector<8x128xf32> to vector<1x128xf32>
    %7 = vector.extract_strided_slice %1 {offsets = [7, 0], sizes = [1, 128], strides = [1, 1]} : vector<8x128xf32> to vector<1x128xf32>
    %8 = math.log %3 : vector<4x128xf32>
    %cst = arith.constant 0.000000e+00 : f32
    %9 = vector.broadcast %cst : f32 to vector<4x128xf32>
    %10 = arith.subf %9, %8 : vector<4x128xf32>
    %11 = math.log %10 : vector<4x128xf32>
    %cst_3 = arith.constant 0.000000e+00 : f32
    %12 = vector.broadcast %cst_3 : f32 to vector<4x128xf32>
    %13 = arith.subf %12, %11 : vector<4x128xf32>
    %14 = arith.addf %2, %13 : vector<4x128xf32>
    %cst_4 = arith.constant 1.000000e+00 : f32
    %15 = vector.broadcast %cst_4 : f32 to vector<4x128xf32>
    %16 = arith.mulf %14, %15 : vector<4x128xf32>
    %17 = vector.extract_strided_slice %16 {offsets = [0, 0], sizes = [1, 128], strides = [1, 1]} : vector<4x128xf32> to vector<1x128xf32>
    %18 = vector.extract_strided_slice %16 {offsets = [1, 0], sizes = [1, 128], strides = [1, 1]} : vector<4x128xf32> to vector<1x128xf32>
    %19 = vector.extract_strided_slice %16 {offsets = [2, 0], sizes = [1, 128], strides = [1, 1]} : vector<4x128xf32> to vector<1x128xf32>
    %20 = vector.extract_strided_slice %16 {offsets = [3, 0], sizes = [1, 128], strides = [1, 1]} : vector<4x128xf32> to vector<1x128xf32>
    %cst_5 = arith.constant 0.000000e+00 : f32
    %21 = vector.broadcast %cst_5 : f32 to vector<1x128xf32>
    %22 = arith.cmpf ogt, %18, %17 : vector<1x128xf32>
    %cst_6 = arith.constant 1.000000e+00 : f32
    %23 = vector.broadcast %cst_6 : f32 to vector<1x128xf32>
    %24 = arith.select %22, %23, %21 : vector<1x128xi1>, vector<1x128xf32>
    %25 = arith.select %22, %18, %17 : vector<1x128xi1>, vector<1x128xf32>
    %26 = arith.cmpf ogt, %19, %25 : vector<1x128xf32>
    %cst_7 = arith.constant 2.000000e+00 : f32
    %27 = vector.broadcast %cst_7 : f32 to vector<1x128xf32>
    %28 = arith.select %26, %27, %24 : vector<1x128xi1>, vector<1x128xf32>
    %29 = arith.select %26, %19, %25 : vector<1x128xi1>, vector<1x128xf32>
    %30 = arith.cmpf ogt, %20, %29 : vector<1x128xf32>
    %cst_8 = arith.constant 3.000000e+00 : f32
    %31 = vector.broadcast %cst_8 : f32 to vector<1x128xf32>
    %32 = arith.select %30, %31, %28 : vector<1x128xi1>, vector<1x128xf32>
    %33 = arith.select %30, %20, %29 : vector<1x128xi1>, vector<1x128xf32>
    %34 = arith.subf %17, %33 : vector<1x128xf32>
    %35 = math.exp %34 : vector<1x128xf32>
    %36 = arith.subf %18, %33 : vector<1x128xf32>
    %37 = math.exp %36 : vector<1x128xf32>
    %38 = arith.subf %19, %33 : vector<1x128xf32>
    %39 = math.exp %38 : vector<1x128xf32>
    %40 = arith.subf %20, %33 : vector<1x128xf32>
    %41 = math.exp %40 : vector<1x128xf32>
    %42 = arith.addf %35, %37 : vector<1x128xf32>
    %43 = arith.addf %42, %39 : vector<1x128xf32>
    %44 = arith.addf %43, %41 : vector<1x128xf32>
    %cst_9 = arith.constant 1.000000e+00 : f32
    %45 = vector.broadcast %cst_9 : f32 to vector<1x128xf32>
    %46 = arith.divf %45, %44 : vector<1x128xf32>
    %47 = arith.mulf %35, %46 : vector<1x128xf32>
    %48 = arith.mulf %37, %46 : vector<1x128xf32>
    %49 = arith.mulf %39, %46 : vector<1x128xf32>
    %50 = arith.mulf %41, %46 : vector<1x128xf32>
    %cst_10 = arith.constant 0.000000e+00 : f32
    %51 = vector.broadcast %cst_10 : f32 to vector<1x128xf32>
    %52 = arith.cmpf oeq, %32, %51 : vector<1x128xf32>
    %53 = arith.extui %52 : vector<1x128xi1> to vector<1x128xi32>
    %54 = arith.sitofp %53 : vector<1x128xi32> to vector<1x128xf32>
    %cst_11 = arith.constant 1.000000e+00 : f32
    %55 = vector.broadcast %cst_11 : f32 to vector<1x128xf32>
    %56 = arith.cmpf oeq, %32, %55 : vector<1x128xf32>
    %57 = arith.extui %56 : vector<1x128xi1> to vector<1x128xi32>
    %58 = arith.sitofp %57 : vector<1x128xi32> to vector<1x128xf32>
    %cst_12 = arith.constant 2.000000e+00 : f32
    %59 = vector.broadcast %cst_12 : f32 to vector<1x128xf32>
    %60 = arith.cmpf oeq, %32, %59 : vector<1x128xf32>
    %61 = arith.extui %60 : vector<1x128xi1> to vector<1x128xi32>
    %62 = arith.sitofp %61 : vector<1x128xi32> to vector<1x128xf32>
    %cst_13 = arith.constant 3.000000e+00 : f32
    %63 = vector.broadcast %cst_13 : f32 to vector<1x128xf32>
    %64 = arith.cmpf oeq, %32, %63 : vector<1x128xf32>
    %65 = arith.extui %64 : vector<1x128xi1> to vector<1x128xi32>
    %66 = arith.sitofp %65 : vector<1x128xi32> to vector<1x128xf32>
    %67 = math.log %5 : vector<3x128xf32>
    %cst_14 = arith.constant 0.000000e+00 : f32
    %68 = vector.broadcast %cst_14 : f32 to vector<3x128xf32>
    %69 = arith.subf %68, %67 : vector<3x128xf32>
    %70 = math.log %69 : vector<3x128xf32>
    %cst_15 = arith.constant 0.000000e+00 : f32
    %71 = vector.broadcast %cst_15 : f32 to vector<3x128xf32>
    %72 = arith.subf %71, %70 : vector<3x128xf32>
    %73 = arith.addf %4, %72 : vector<3x128xf32>
    %cst_16 = arith.constant 1.000000e+00 : f32
    %74 = vector.broadcast %cst_16 : f32 to vector<3x128xf32>
    %75 = arith.mulf %73, %74 : vector<3x128xf32>
    %76 = vector.extract_strided_slice %75 {offsets = [0, 0], sizes = [1, 128], strides = [1, 1]} : vector<3x128xf32> to vector<1x128xf32>
    %77 = vector.extract_strided_slice %75 {offsets = [1, 0], sizes = [1, 128], strides = [1, 1]} : vector<3x128xf32> to vector<1x128xf32>
    %78 = vector.extract_strided_slice %75 {offsets = [2, 0], sizes = [1, 128], strides = [1, 1]} : vector<3x128xf32> to vector<1x128xf32>
    %cst_17 = arith.constant 0.000000e+00 : f32
    %79 = vector.broadcast %cst_17 : f32 to vector<1x128xf32>
    %80 = arith.cmpf ogt, %77, %76 : vector<1x128xf32>
    %cst_18 = arith.constant 1.000000e+00 : f32
    %81 = vector.broadcast %cst_18 : f32 to vector<1x128xf32>
    %82 = arith.select %80, %81, %79 : vector<1x128xi1>, vector<1x128xf32>
    %83 = arith.select %80, %77, %76 : vector<1x128xi1>, vector<1x128xf32>
    %84 = arith.cmpf ogt, %78, %83 : vector<1x128xf32>
    %cst_19 = arith.constant 2.000000e+00 : f32
    %85 = vector.broadcast %cst_19 : f32 to vector<1x128xf32>
    %86 = arith.select %84, %85, %82 : vector<1x128xi1>, vector<1x128xf32>
    %87 = arith.select %84, %78, %83 : vector<1x128xi1>, vector<1x128xf32>
    %88 = arith.subf %76, %87 : vector<1x128xf32>
    %89 = math.exp %88 : vector<1x128xf32>
    %90 = arith.subf %77, %87 : vector<1x128xf32>
    %91 = math.exp %90 : vector<1x128xf32>
    %92 = arith.subf %78, %87 : vector<1x128xf32>
    %93 = math.exp %92 : vector<1x128xf32>
    %94 = arith.addf %89, %91 : vector<1x128xf32>
    %95 = arith.addf %94, %93 : vector<1x128xf32>
    %cst_20 = arith.constant 1.000000e+00 : f32
    %96 = vector.broadcast %cst_20 : f32 to vector<1x128xf32>
    %97 = arith.divf %96, %95 : vector<1x128xf32>
    %98 = arith.mulf %89, %97 : vector<1x128xf32>
    %99 = arith.mulf %91, %97 : vector<1x128xf32>
    %100 = arith.mulf %93, %97 : vector<1x128xf32>
    %cst_21 = arith.constant 0.000000e+00 : f32
    %101 = vector.broadcast %cst_21 : f32 to vector<1x128xf32>
    %102 = arith.cmpf oeq, %86, %101 : vector<1x128xf32>
    %103 = arith.extui %102 : vector<1x128xi1> to vector<1x128xi32>
    %104 = arith.sitofp %103 : vector<1x128xi32> to vector<1x128xf32>
    %cst_22 = arith.constant 1.000000e+00 : f32
    %105 = vector.broadcast %cst_22 : f32 to vector<1x128xf32>
    %106 = arith.cmpf oeq, %86, %105 : vector<1x128xf32>
    %107 = arith.extui %106 : vector<1x128xi1> to vector<1x128xi32>
    %108 = arith.sitofp %107 : vector<1x128xi32> to vector<1x128xf32>
    %cst_23 = arith.constant 2.000000e+00 : f32
    %109 = vector.broadcast %cst_23 : f32 to vector<1x128xf32>
    %110 = arith.cmpf oeq, %86, %109 : vector<1x128xf32>
    %111 = arith.extui %110 : vector<1x128xi1> to vector<1x128xi32>
    %112 = arith.sitofp %111 : vector<1x128xi32> to vector<1x128xf32>
    %113 = math.log %7 : vector<1x128xf32>
    %cst_24 = arith.constant 1.000000e+00 : f32
    %114 = vector.broadcast %cst_24 : f32 to vector<1x128xf32>
    %115 = arith.subf %114, %7 : vector<1x128xf32>
    %116 = math.log %115 : vector<1x128xf32>
    %117 = arith.subf %113, %116 : vector<1x128xf32>
    %118 = arith.addf %6, %117 : vector<1x128xf32>
    %cst_25 = arith.constant 1.000000e+00 : f32
    %119 = vector.broadcast %cst_25 : f32 to vector<1x128xf32>
    %120 = arith.mulf %118, %119 : vector<1x128xf32>
    %cst_26 = arith.constant 0.000000e+00 : f32
    %121 = vector.broadcast %cst_26 : f32 to vector<1x128xf32>
    %122 = arith.subf %121, %120 : vector<1x128xf32>
    %123 = math.exp %122 : vector<1x128xf32>
    %cst_27 = arith.constant 1.000000e+00 : f32
    %124 = vector.broadcast %cst_27 : f32 to vector<1x128xf32>
    %125 = arith.addf %124, %123 : vector<1x128xf32>
    %cst_28 = arith.constant 1.000000e+00 : f32
    %126 = vector.broadcast %cst_28 : f32 to vector<1x128xf32>
    %127 = arith.divf %126, %125 : vector<1x128xf32>
    %cst_29 = arith.constant 5.000000e-01 : f32
    %128 = vector.broadcast %cst_29 : f32 to vector<1x128xf32>
    %129 = arith.cmpf ogt, %127, %128 : vector<1x128xf32>
    %130 = arith.extui %129 : vector<1x128xi1> to vector<1x128xi32>
    %131 = arith.sitofp %130 : vector<1x128xi32> to vector<1x128xf32>
    %132 = tpu.concatenate %47, %48, %49, %50, %54, %58, %62, %66, %98, %99, %100, %104, %108, %112, %127, %131 in 0 : vector<1x128xf32>, vector<1x128xf32>, vector<1x128xf32>, vector<1x128xf32>, vector<1x128xf32>, vector<1x128xf32>, vector<1x128xf32>, vector<1x128xf32>, vector<1x128xf32>, vector<1x128xf32>, vector<1x128xf32>, vector<1x128xf32>, vector<1x128xf32>, vector<1x128xf32>, vector<1x128xf32>, vector<1x128xf32> -> vector<16x128xf32>
    %c0_30 = arith.constant 0 : index
    %c0_31 = arith.constant 0 : index
    %133 = vector.load %arg2[%c0_30, %c0_31] : memref<16x128xf32, #tpu.memory_space<vmem>>, vector<16x128xf32>
    tpu.vector_store %arg2[%c0_30, %c0_31], %132 {strides = array<i32>} : memref<16x128xf32, #tpu.memory_space<vmem>>, vector<16x128xf32>,
    return
  }
}

</mosaic_0001>

<bundles_post_ra>
// kernel: _forward_impl.1
= control target key start
LH: loop header
LB: loop body
LE: loop exit
PB: predicated region body
PF: predicated region fallthrough
CT: control target
= control target key end

     0   :  { %v251_v47 = vmov 0.0   ;;  %vm187_vm7 = vcmask 1040384   ;;  %vm189_vm8 = vcmask 1041408   ;;  %vm191_vm9 = vcmask 1042432   ;;  %s327_s1 = inlined_call_operand.vmem [shape: f32[8,128], index: 1, kind: input, shape index: {}]   ;;  %s328_s0 = inlined_call_operand.vmem [shape: f32[8,128], index: 0, kind: input, shape index: {}]   ;;  %s329_s2 = inlined_call_operand.vmem [shape: f32[16,128], index: 2, kind: output, shape index: {}]  }
   0x1   :  { %v12_v0 = vld [vmem:[%s327_s1] sm:$0xff]  ;;  %vm193_vm10 = vcmask 1043456   ;;  %vm195_vm11 = vcmask 1044480   ;;  %vm197_vm14 = vcmask 1045504  }
   0x2   :  { %223 = vlog2.f32 %v12_v0  ;;  %v140_v4 = vsub.f32 1.0, %v12_v0  ;;  %v11_v7 = vld [vmem:[%s328_s0] sm:$0xff] }
   0xc   :  { %v224_v1 = vpop.eup %223 }
   0xd   :  { %v14_v2 = vmul.f32 0.6931472, %v224_v1 }
   0xf   :  { %v15_v3 = vsub.f32 0.0, %v14_v2 }
  0x11   :  { %225 = vlog2.f32 %v15_v3 }
  0x12   :  { %227 = vlog2.f32 %v140_v4 }
  0x1b   :  { %v226_v5 = vpop.eup %225 }
  0x1c   :  { %v17_v6 = vmul.f32 0.6931472, %v226_v5  ;;  %v228_v11 = vpop.eup %227 }
  0x1d   :  { %v142_v15 = vmul.f32 0.6931472, %v228_v11 }
  0x1e   :  { %v18_v8 = vsub.f32 0.0, %v17_v6 }
  0x1f   :  { %v143_v22 = vsub.f32 %v14_v2, %v142_v15 }
  0x20   :  { %v19_v9 = vadd.f32 %v18_v8, %v11_v7 }
  0x21   :  { %v144_v32 = vadd.f32 %v143_v22, %v11_v7 }
  0x22   :  { %v21_v10 = vrot.slane %v19_v9, 7 }
  0x23   :  { %v145_v42 = vsub.f32 0.0, %v144_v32 }
  0x24   :  { %vm273_vm0 = vcmp.gt.f32.partialorder %v19_v9, %v21_v10 }
  0x25   :  { %v25_v13 = vsel %vm273_vm0, %v19_v9, %v21_v10  ;;  %v146_v43 = vmul.f32 1.442695, %v145_v42  ;;  %v24_v48 = vsel %vm273_vm0, 1.0, %v251_v47  ;;  %vm199_vm0 = vcmask 1046528  }
  0x26   :  { %v27_v14 = vrot.slane %v25_v13, 7  ;;  %v31_v53 = vrot.slane %v24_v48, 7 }
  0x28   :  { %vm279_vm1 = vcmp.gt.f32.partialorder %v19_v9, %v27_v14 }
  0x29   :  { %v34_v17 = vsel %vm279_vm1, %v19_v9, %v27_v14  ;;  %v33_v61 = vsel %vm279_vm1, 2.0, %v31_v53 }
  0x2a   :  { %v36_v18 = vrot.slane %v34_v17, 7  ;;  %v100_v19 = vrot.slane %v34_v17, 2  ;;  %v105_v20 = vrot.slane %v34_v17, 1  ;;  %v110_v21 = vsub.f32 %v19_v9, %v34_v17 }
  0x2b   :  { %v40_v2 = vrot.slane %v33_v61, 7  ;;  %vm131_vm3 = vcmp.eq.f32.partialorder %v33_v61, 0.0  ;;  %vm134_vm6 = vcmp.eq.f32.partialorder %v33_v61, 1.0  ;;  %vm137_vm13 = vcmp.eq.f32.partialorder %v33_v61, 2.0 }
  0x2c   :  { %vm285_vm2 = vcmp.gt.f32.partialorder %v19_v9, %v36_v18  ;;  %v102_v29 = vsub.f32 %v19_v9, %v100_v19  ;;  %v107_v30 = vsub.f32 %v19_v9, %v105_v20  ;;  %v111_v31 = vmul.f32 1.442695, %v110_v21 }
  0x2d   :  { %v43_v24 = vsel %vm285_vm2, %v19_v9, %v36_v18  ;;  %v42_v4 = vsel %vm285_vm2, 3.0, %v40_v2  ;;  %v218_v5 = vsel %vm131_vm3, 1.0, %v251_v47 }
  0x2e   :  { %v45_v25 = vrot.slane %v43_v24, 3  ;;  %v50_v26 = vrot.slane %v43_v24, 2  ;;  %v55_v27 = vrot.slane %v43_v24, 1  ;;  %v60_v28 = vsub.f32 %v19_v9, %v43_v24 }
  0x2f   :  { %v103_v40 = vmul.f32 1.442695, %v102_v29  ;;  %v108_v41 = vmul.f32 1.442695, %v107_v30  ;;  %vm88_vm4 = vcmp.eq.f32.partialorder %v42_v4, 0.0  ;;  %vm91_vm5 = vcmp.eq.f32.partialorder %v42_v4, 1.0 }
  0x30   :  { %v47_v33 = vsub.f32 %v19_v9, %v45_v25  ;;  %v52_v34 = vsub.f32 %v19_v9, %v50_v26  ;;  %v57_v35 = vsub.f32 %v19_v9, %v55_v27  ;;  %v61_v36 = vmul.f32 1.442695, %v60_v28 }
  0x31   :  { %vm94_vm12 = vcmp.eq.f32.partialorder %v42_v4, 2.0  ;;  %v214_v7 = vsel %vm88_vm4, 1.0, %v251_v47  ;;  %v215_v8 = vsel %vm91_vm5, 1.0, %v251_v47  ;;  %vm97_vm15 = vcmp.eq.f32.partialorder %v42_v4, 3.0 }
  0x32   :  { %v48_v37 = vmul.f32 1.442695, %v47_v33  ;;  %v53_v38 = vmul.f32 1.442695, %v52_v34  ;;  %v58_v39 = vmul.f32 1.442695, %v57_v35  ;;  %229 = vpow2.f32 %v61_v36 }
  0x33   :  { %231 = vpow2.f32 %v111_v31  ;;  %v219_v9 = vsel %vm134_vm6, 1.0, %v251_v47  ;;  %v216_v15 = vsel %vm94_vm12, 1.0, %v251_v47  ;;  %v217_v22 = vsel %vm97_vm15, 1.0, %v251_v47 }
  0x34   :  { %233 = vpow2.f32 %v48_v37  ;;  %v155_v25 = vrot.slane %v214_v7, 7  ;;  %v220_v28 = vsel %vm137_vm13, 1.0, %v251_v47  ;;  %v158_v29 = vrot.slane %v215_v8, 6 }
  0x35   :  { %235 = vpow2.f32 %v53_v38  ;;  %v161_v30 = vrot.slane %v216_v15, 5  ;;  %v176_v34 = vrot.slane %v218_v5, 3  ;;  %v164_v36 = vrot.slane %v217_v22, 4 }
  0x36   :  { %237 = vpow2.f32 %v58_v39  ;;  %v179_v37 = vrot.slane %v219_v9, 2  ;;  %v182_v39 = vrot.slane %v220_v28, 1 }
  0x37   :  { %239 = vpow2.f32 %v103_v40 }
  0x38   :  { %241 = vpow2.f32 %v108_v41 }
  0x39   :  { %243 = vpow2.f32 %v146_v43 }
  0x3c   :  { %v230_v44 = vpop.eup %229 }
  0x3d   :  { %v232_v45 = vpop.eup %231  ;;  %v72_v57 = vrot.slane %v230_v44, 3 }
  0x3e   :  { %v234_v46 = vpop.eup %233  ;;  %v118_v59 = vrot.slane %v232_v45, 2 }
  0x3f   :  { %v236_v49 = vpop.eup %235 }
  0x40   :  { %v238_v50 = vpop.eup %237  ;;  %v64_v51 = vrot.slane %v236_v49, 1 }
  0x41   :  { %v240_v52 = vpop.eup %239  ;;  %v68_v54 = vrot.slane %v238_v50, 2 }
  0x42   :  { %v242_v55 = vpop.eup %241  ;;  %v66_v56 = vadd.f32 %v234_v46, %v64_v51 }
  0x43   :  { %v114_v58 = vrot.slane %v242_v55, 1  ;;  %v244_v63 = vpop.eup %243 }
  0x44   :  { %v70_v60 = vadd.f32 %v68_v54, %v66_v56  ;;  %v148_v3 = vadd.f32 1.0, %v244_v63 }
  0x45   :  { %v116_v62 = vadd.f32 %v240_v52, %v114_v58 }
  0x46   :  { %v74_v0 = vadd.f32 %v72_v57, %v70_v60 }
  0x47   :  { %v120_v1 = vadd.f32 %v118_v59, %v116_v62 }
  0x48   :  { %245 = vrcp.f32 %v74_v0 }
  0x49   :  { %247 = vrcp.f32 %v120_v1 }
  0x4a   :  { %249 = vrcp.f32 %v148_v3 }
  0x52   :  { %v246_v6 = vpop.eup %245 }
  0x53   :  { %v248_v10 = vpop.eup %247  ;;  %v77_v11 = vmul.f32 %v246_v6, %v234_v46  ;;  %v79_v12 = vrot.slane %v246_v6, 7  ;;  %v82_v13 = vrot.slane %v246_v6, 6  ;;  %v85_v14 = vrot.slane %v246_v6, 5 }
  0x54   :  { %v123_v16 = vmul.f32 %v248_v10, %v240_v52  ;;  %v125_v17 = vrot.slane %v248_v10, 7  ;;  %v128_v18 = vrot.slane %v248_v10, 6  ;;  %v250_v27 = vpop.eup %249 }
  0x55   :  { %v81_v19 = vmul.f32 %v236_v49, %v79_v12  ;;  %v84_v20 = vmul.f32 %v238_v50, %v82_v13  ;;  %v87_v21 = vmul.f32 %v230_v44, %v85_v14  ;;  %vm151_vm1 = vcmp.gt.f32.partialorder %v250_v27, 0.5 }
  0x56   :  { %v127_v23 = vmul.f32 %v242_v55, %v125_v17  ;;  %v130_v24 = vmul.f32 %v232_v45, %v128_v18  ;;  %v167_v26 = vrot.slane %v123_v16, 4  ;;  %v185_v42 = vrot.slane %v250_v27, 1 }
  0x57   :  { %v188_v31 = vsel %vm187_vm7, %v77_v11, %v81_v19  ;;  %v221_v48 = vsel %vm151_vm1, 1.0, %v251_v47 }
  0x58   :  { %v170_v32 = vrot.slane %v127_v23, 4  ;;  %v173_v33 = vrot.slane %v130_v24, 4  ;;  %v190_v35 = vsel %vm189_vm8, %v188_v31, %v84_v20 }
  0x59   :  { %v192_v38 = vsel %vm191_vm9, %v190_v35, %v87_v21 }
  0x5a   :  { %v194_v40 = vsel %vm193_vm10, %v192_v38, %v155_v25  ;;  %v201_v41 = vsel %vm187_vm7, %v167_v26, %v170_v32 }
  0x5b   :  { %v196_v43 = vsel %vm195_vm11, %v194_v40, %v158_v29  ;;  %v202_v44 = vsel %vm189_vm8, %v201_v41, %v173_v33 }
  0x5c   :  { %v198_v45 = vsel %vm197_vm14, %v196_v43, %v161_v30  ;;  %v203_v46 = vsel %vm191_vm9, %v202_v44, %v176_v34 }
  0x5d   :  { %v200_v49 = vsel %vm199_vm0, %v198_v45, %v164_v36  ;;  %v204_v50 = vsel %vm193_vm10, %v203_v46, %v179_v37 }
  0x5e   :  { %v205_v51 = vsel %vm195_vm11, %v204_v50, %v182_v39  ;;  %208 = vst [vmem:[%s329_s2] sm:$0xff] %v200_v49 }
  0x5f   :  { %v206_v52 = vsel %vm197_vm14, %v205_v51, %v185_v42 }
  0x60   :  { %v207_v53 = vsel %vm199_vm0, %v206_v52, %v221_v48 }
  0x61   :  { %209 = vst [vmem:[%s329_s2 + $0x8] sm:$0xff] %v207_v53 }

</bundles_post_ra>
